<compile_context>
chip_gen: v6e
topology: v6e:2x2x1
jax: 0.10.0
libtpu: 0.0.40
codegen_flags: <defaults>
</compile_context>

<pallas_src>
import functools

import jax
import jax.numpy as jnp
from jax.experimental import pallas as pl
from jax.experimental.pallas import tpu as pltpu


LANE = 128
# Raw-bytes budget under which the whole support tensor (or one batch of it)
# is kept VMEM-resident inside the aggregation kernel. Conservative for v7x's
# 32 MiB scoped default even if the constant block ends up double-buffered.
_S_RESIDENT_BUDGET = 8 * 1024 * 1024
# VMEM budget for keeping the full weight matrix resident in the support matmul.
_W_RESIDENT_BUDGET = 24 * 1024 * 1024


def _round_up(v, m):
    return (v + m - 1) // m * m


def _pick_node_tile(n):
    """MXU-friendly row/K tile for the node dimension (256+ fills v6e/v7x MXU)."""
    if n >= 2048:
        return 512
    if n >= 256:
        return 256
    return 128


# ---------------------------------------------------------------------------
# Kernel 1: support = X @ W, with batch folded into the row dimension.
#   X2D: (M, K) = (B*Np, F)   W: (K, N)   out: (M, N)
# ---------------------------------------------------------------------------
def _support_kernel(x_ref, w_ref, o_ref):
    o_ref[...] = jnp.dot(
        x_ref[...], w_ref[...], preferred_element_type=jnp.float32
    ).astype(o_ref.dtype)


def _support_kernel_ktiled(x_ref, w_ref, o_ref, acc_ref):
    @pl.when(pl.program_id(1) == 0)
    def _init():
        acc_ref[...] = jnp.zeros_like(acc_ref)

    acc_ref[...] += jnp.dot(
        x_ref[...], w_ref[...], preferred_element_type=jnp.float32
    )

    @pl.when(pl.program_id(1) == pl.num_programs(1) - 1)
    def _finalize():
        o_ref[...] = acc_ref[...].astype(o_ref.dtype)


def _support_matmul(x2d, w, *, tm, out_dtype):
    M, K = x2d.shape
    Kw, N = w.shape
    assert K == Kw and M % tm == 0
    out_itemsize = jnp.dtype(out_dtype).itemsize

    flops = 2 * M * K * N
    bytes_accessed = (M * K + K * N) * x2d.dtype.itemsize + M * N * out_itemsize

    # VMEM footprint if W stays fully resident (double-buffered x/out tiles).
    resident_bytes = (
        2 * K * N * w.dtype.itemsize
        + 2 * tm * K * x2d.dtype.itemsize
        + 2 * tm * N * out_itemsize
    )

    if resident_bytes <= _W_RESIDENT_BUDGET:
        return pl.pallas_call(
            _support_kernel,
            out_shape=jax.ShapeDtypeStruct((M, N), out_dtype),
            grid_spec=pltpu.PrefetchScalarGridSpec(
                num_scalar_prefetch=0,
                grid=(M // tm,),
                in_specs=[
                    pl.BlockSpec((tm, K), lambda i: (i, 0)),
                    # Constant block index -> W DMA'd once, stays VMEM-resident.
                    pl.BlockSpec((K, N), lambda i: (0, 0)),
                ],
                out_specs=pl.BlockSpec((tm, N), lambda i: (i, 0)),
            ),
            compiler_params=pltpu.CompilerParams(
                dimension_semantics=("parallel",),
            ),
            cost_estimate=pl.CostEstimate(
                flops=flops, transcendentals=0, bytes_accessed=bytes_accessed
            ),
        )(x2d, w)

    # Very wide feature dim: K-tile with an f32 accumulator instead of relying
    # on a huge VMEM-resident weight block (keeps v7x's 64 MiB VMEM happy).
    tk = 512 if K % 512 == 0 else (256 if K % 256 == 0 else 128)
    return pl.pallas_call(
        _support_kernel_ktiled,
        out_shape=jax.ShapeDtypeStruct((M, N), out_dtype),
        grid_spec=pltpu.PrefetchScalarGridSpec(
            num_scalar_prefetch=0,
            grid=(M // tm, K // tk),
            in_specs=[
                pl.BlockSpec((tm, tk), lambda i, k: (i, k)),
                pl.BlockSpec((tk, N), lambda i, k: (k, 0)),
            ],
            out_specs=pl.BlockSpec((tm, N), lambda i, k: (i, 0)),
            scratch_shapes=[pltpu.VMEM((tm, N), jnp.float32)],
        ),
        compiler_params=pltpu.CompilerParams(
            dimension_semantics=("parallel", "arbitrary"),
        ),
        cost_estimate=pl.CostEstimate(
            flops=flops, transcendentals=0, bytes_accessed=bytes_accessed
        ),
    )(x2d, w)


# ---------------------------------------------------------------------------
# Kernel 2: out[b] = (relu?)(adj[b] @ s[b]) (@ W2)
#   adj tiled into (tm, tk) row/K blocks; f32 accumulator in VMEM scratch;
#   s kept VMEM-resident (whole / per-batch) when it fits, else streamed.
# ---------------------------------------------------------------------------
def _aggregate_kernel(adj_ref, s_ref, *rest, tk, rows_per_batch, apply_relu,
                      fuse_w, s_mode):
    if fuse_w:
        w_ref, o_ref, acc_ref = rest
    else:
        w_ref = None
        o_ref, acc_ref = rest

    k = pl.program_id(2)

    @pl.when(k == 0)
    def _init():
        acc_ref[...] = jnp.zeros_like(acc_ref)

    if s_mode == "all":
        # s is the whole (B*Np, H) support tensor, VMEM-resident; slice the
        # (tk, H) K-block for this (batch, k) grid point.
        b = pl.program_id(1)
        row0 = pl.multiple_of(b * rows_per_batch + k * tk, tk)
        s_blk = s_ref[pl.ds(row0, tk), :]
    elif s_mode == "batch":
        # s is this batch's (Np, H) support tensor, VMEM-resident.
        row0 = pl.multiple_of(k * tk, tk)
        s_blk = s_ref[pl.ds(row0, tk), :]
    else:  # "stream"
        s_blk = s_ref[...]

    acc_ref[...] += jnp.dot(adj_ref[...], s_blk, preferred_element_type=jnp.float32)

    @pl.when(k == pl.num_programs(2) - 1)
    def _finalize():
        r = acc_ref[...]
        if apply_relu:
            r = jnp.maximum(r, 0.0)
        if w_ref is not None:
            # Fused epilogue: relu(adj @ s) @ W2 — runs once per row tile and
            # lands in the MXU slack of this DMA-bound kernel.
            r = jnp.dot(
                r.astype(w_ref.dtype), w_ref[...],
                preferred_element_type=jnp.float32,
            )
        o_ref[...] = r.astype(o_ref.dtype)


def _aggregate(adj, s, w=None, *, tm, tk, apply_relu, out_dtype):
    B, Np, Np2 = adj.shape
    B2, Np3, H = s.shape
    assert B == B2 and Np == Np2 == Np3
    assert Np % tm == 0 and Np % tk == 0
    out_cols = w.shape[1] if w is not None else H

    s_bytes = B * Np * H * s.dtype.itemsize
    if s_bytes <= _S_RESIDENT_BUDGET:
        s_mode = "all"        # whole support tensor VMEM-resident, fetched once
    elif s_bytes // B <= _S_RESIDENT_BUDGET:
        s_mode = "batch"      # one batch's support VMEM-resident at a time
    else:
        s_mode = "stream"     # fall back to per-K-tile streaming

    if s_mode == "batch":
        # Batch outermost so the per-batch resident s block is fetched B times total.
        grid = (B, Np // tm, Np // tk)
        adj_spec = pl.BlockSpec((pl.Squeezed(), tm, tk), lambda b, i, k: (b, i, k))
        s_arg = s
        s_spec = pl.BlockSpec((pl.Squeezed(), Np, H), lambda b, i, k: (b, 0, 0))
        w_spec = pl.BlockSpec((H, out_cols), lambda b, i, k: (0, 0))
        out_spec = pl.BlockSpec(
            (pl.Squeezed(), tm, out_cols), lambda b, i, k: (b, i, 0))
    else:
        # Row-tile axis leads so v7x's two TensorCores split work even at B == 1.
        grid = (Np // tm, B, Np // tk)
        adj_spec = pl.BlockSpec((pl.Squeezed(), tm, tk), lambda i, b, k: (b, i, k))
        if s_mode == "all":
            s_arg = s.reshape(B * Np, H)
            s_spec = pl.BlockSpec((B * Np, H), lambda i, b, k: (0, 0))
        else:
            s_arg = s
            s_spec = pl.BlockSpec((pl.Squeezed(), tk, H), lambda i, b, k: (b, k, 0))
        w_spec = pl.BlockSpec((H, out_cols), lambda i, b, k: (0, 0))
        out_spec = pl.BlockSpec(
            (pl.Squeezed(), tm, out_cols), lambda i, b, k: (b, i, 0))

    in_specs = [adj_spec, s_spec]
    args = [adj, s_arg]
    if w is not None:
        in_specs.append(w_spec)
        args.append(w)

    kernel = functools.partial(
        _aggregate_kernel,
        tk=tk,
        rows_per_batch=Np,
        apply_relu=apply_relu,
        fuse_w=w is not None,
        s_mode=s_mode,
    )

    s_refetches = {"all": 1, "batch": 1, "stream": Np // tm}[s_mode]
    flops = 2 * B * Np * Np * H + (2 * B * Np * H * out_cols if w is not None else 0)
    bytes_accessed = (
        B * Np * Np * adj.dtype.itemsize
        + s_refetches * B * Np * H * s.dtype.itemsize
        + (H * out_cols * w.dtype.itemsize if w is not None else 0)
        + B * Np * out_cols * jnp.dtype(out_dtype).itemsize
    )

    return pl.pallas_call(
        kernel,
        out_shape=jax.ShapeDtypeStruct((B, Np, out_cols), out_dtype),
        grid_spec=pltpu.PrefetchScalarGridSpec(
            num_scalar_prefetch=0,
            grid=grid,
            in_specs=in_specs,
            out_specs=out_spec,
            scratch_shapes=[pltpu.VMEM((tm, H), jnp.float32)],
        ),
        compiler_params=pltpu.CompilerParams(
            dimension_semantics=("parallel", "parallel", "arbitrary"),
        ),
        cost_estimate=pl.CostEstimate(
            flops=flops, transcendentals=0, bytes_accessed=bytes_accessed
        ),
    )(*args)


# ---------------------------------------------------------------------------
# Full GCN forward.
# ---------------------------------------------------------------------------
def prepare_adjacency(adj, *, compute_dtype=jnp.bfloat16):
    """Pad + cast adj once; reuse across forward calls to skip that HBM pass."""
    B, N, N2 = adj.shape
    assert N == N2
    Np = _round_up(N, _pick_node_tile(N))
    return jnp.pad(adj, ((0, 0), (0, Np - N), (0, Np - N))).astype(compute_dtype)


def gcn_forward(x, adj, w1, w2, *, compute_dtype=jnp.bfloat16):
    B, N, F_in = x.shape
    H = w1.shape[1]
    F_out = w2.shape[1]
    assert w1.shape == (F_in, H) and w2.shape == (H, F_out)
    out_dtype = x.dtype

    tile = _pick_node_tile(N)
    Np = _round_up(N, tile)
    Fp = _round_up(F_in, LANE)
    Hp = _round_up(H, LANE)
    Fop = _round_up(F_out, LANE)
    tm = tk = tile

    # Accept an already-padded bf16 adjacency (see prepare_adjacency) so the
    # pad + cast pass over B*N^2 is not repeated every call.
    if adj.shape == (B, Np, Np) and adj.dtype == jnp.dtype(compute_dtype):
        adj_p = adj
    else:
        assert adj.shape == (B, N, N)
        adj_p = jnp.pad(adj, ((0, 0), (0, Np - N), (0, Np - N))).astype(compute_dtype)

    # Zero-pad + cast to bf16 (padding contributes exact zeros everywhere).
    x_p = jnp.pad(x, ((0, 0), (0, Np - N), (0, Fp - F_in))).astype(compute_dtype)
    w1_p = jnp.pad(w1, ((0, Fp - F_in), (0, Hp - H))).astype(compute_dtype)
    w2_p = jnp.pad(w2, ((0, Hp - H), (0, Fop - F_out))).astype(compute_dtype)

    # Layer 1 support: s1 = X @ W1   (batch folded into the row dimension).
    # TODO(synk): optionally fuse X @ W1 into the layer-1 aggregation when
    # Fp <= tm to drop the s1 HBM round trip as well.
    s1 = _support_matmul(x_p.reshape(B * Np, Fp), w1_p, tm=tm, out_dtype=compute_dtype)

    # Layer-1 aggregation fused with relu and the layer-2 weight matmul:
    #   s2 = relu(adj @ s1) @ W2
    s2 = _aggregate(
        adj_p, s1.reshape(B, Np, Hp), w2_p,
        tm=tm, tk=tk, apply_relu=True, out_dtype=compute_dtype,
    )

    # Layer-2 aggregation: out = adj @ s2
    out_p = _aggregate(
        adj_p, s2, None, tm=tm, tk=tk, apply_relu=False, out_dtype=out_dtype,
    )

    return out_p[:, :N, :F_out]


def xavier_uniform(key, shape, dtype=jnp.float32):
    fan_in, fan_out = shape
    limit = (6.0 / (fan_in + fan_out)) ** 0.5
    return jax.random.uniform(key, shape, dtype=dtype, minval=-limit, maxval=limit)


if __name__ == "__main__":
    B, N = 2, 16            # batch, number of graph nodes
    F_in, H, F_out = 8, 32, 16

    key = jax.random.PRNGKey(0)
    k_x, k_adj, k_w1, k_w2 = jax.random.split(key, 4)

    x = jax.random.normal(k_x, (B, N, F_in), dtype=jnp.float32)
    adj = jax.random.uniform(k_adj, (B, N, N), dtype=jnp.float32)

    w1 = xavier_uniform(k_w1, (F_in, H))
    w2 = xavier_uniform(k_w2, (H, F_out))

    # Hoisted: pad + cast the static adjacency once, reuse across calls.
    adj_prepped = prepare_adjacency(adj)

    gcn = jax.jit(gcn_forward)
    out = gcn(x, adj_prepped, w1, w2)
    jax.block_until_ready(out)

    # Reference mirroring the kernel's bf16-compute / f32-accumulate numerics.
    cd = jnp.bfloat16
    s1 = jnp.einsum("bnf,fh->bnh", x.astype(cd), w1.astype(cd),
                    preferred_element_type=jnp.float32).astype(cd)
    h_ref = jax.nn.relu(jnp.einsum("bij,bjh->bih", adj.astype(cd), s1,
                                   preferred_element_type=jnp.float32))
    s2 = jnp.einsum("bnh,ho->bno", h_ref.astype(cd), w2.astype(cd),
                    preferred_element_type=jnp.float32).astype(cd)
    ref = jnp.einsum("bij,bjo->bio", adj.astype(cd), s2,
                     preferred_element_type=jnp.float32)

    assert out.shape == (B, N, F_out)
    assert out.dtype == x.dtype
    err = float(jnp.max(jnp.abs(out - ref)))
    assert jnp.allclose(out, ref, atol=1e-2, rtol=1e-2), err

    print("KERNEL_OK")
</pallas_src>

<mosaic_0001>
module attributes {stable_mosaic.version = 11 : i64} {
  func.func @_support_kernel(%arg0: i32, %arg1: memref<128x128xbf16, #tpu.memory_space<vmem>>, %arg2: memref<128x128xbf16, #tpu.memory_space<vmem>>, %arg3: memref<128x128xbf16, #tpu.memory_space<vmem>>) attributes {dimension_semantics = [#tpu.dimension_semantics<parallel>], iteration_bounds = array<i64: 2>, scalar_prefetch = 0 : i64, scratch_operands = 0 : i64, tpu.core_type = #tpu.core_type<tc>, window_params = [{transform_indices = @transform_0, window_bounds = array<i64: 128, 128>}, {pipeline_mode = #tpu.pipeline_mode<synchronous>, transform_indices = @transform_1, window_bounds = array<i64: 128, 128>}, {transform_indices = @transform_2, window_bounds = array<i64: 128, 128>}]} {
    %c0 = arith.constant 0 : index
    %c0_0 = arith.constant 0 : index
    %0 = vector.load %arg1[%c0, %c0_0] : memref<128x128xbf16, #tpu.memory_space<vmem>>, vector<128x128xbf16>
    %c0_1 = arith.constant 0 : index
    %c0_2 = arith.constant 0 : index
    %1 = vector.load %arg2[%c0_1, %c0_2] : memref<128x128xbf16, #tpu.memory_space<vmem>>, vector<128x128xbf16>
    %cst = arith.constant dense<0.000000e+00> : vector<128x128xf32>
    %2 = tpu.matmul %0, %1, %cst {dimension_numbers = #tpu.dot_dimension_numbers<[1], [0], [0], [1], [0, 0, 1, 1], [], []>} : vector<128x128xbf16>, vector<128x128xbf16>, vector<128x128xf32> -> vector<128x128xf32>
    %3 = arith.truncf %2 : vector<128x128xf32> to vector<128x128xbf16>
    %c0_3 = arith.constant 0 : index
    %c0_4 = arith.constant 0 : index
    %4 = vector.load %arg3[%c0_3, %c0_4] : memref<128x128xbf16, #tpu.memory_space<vmem>>, vector<128x128xbf16>
    tpu.vector_store %arg3[%c0_3, %c0_4], %3 {strides = array<i32>} : memref<128x128xbf16, #tpu.memory_space<vmem>>, vector<128x128xbf16>,
    return
  }
  func.func @transform_0(%arg0: i32) -> (i32, i32) {
    %c0_i32 = arith.constant 0 : i32
    %c0_i32_0 = arith.constant 0 : i32
    return %arg0, %c0_i32 : i32, i32
  }
  func.func @transform_1(%arg0: i32) -> (i32, i32) {
    %c0_i32 = arith.constant 0 : i32
    %c0_i32_0 = arith.constant 0 : i32
    %c0_i32_1 = arith.constant 0 : i32
    return %c0_i32, %c0_i32_0 : i32, i32
  }
  func.func @transform_2(%arg0: i32) -> (i32, i32) {
    %c0_i32 = arith.constant 0 : i32
    %c0_i32_0 = arith.constant 0 : i32
    return %arg0, %c0_i32 : i32, i32
  }
}

module attributes {stable_mosaic.version = 11 : i64} {
  func.func @_aggregate_kernel(%arg0: i32, %arg1: i32, %arg2: i32, %arg3: memref<1x128x128xbf16, #tpu.memory_space<vmem>>, %arg4: memref<256x128xbf16, #tpu.memory_space<vmem>>, %arg5: memref<128x128xbf16, #tpu.memory_space<vmem>>, %arg6: memref<1x128x128xbf16, #tpu.memory_space<vmem>>, %arg7: memref<128x128xf32, #tpu.memory_space<vmem>>) attributes {dimension_semantics = [#tpu.dimension_semantics<parallel>, #tpu.dimension_semantics<parallel>, #tpu.dimension_semantics<arbitrary>], iteration_bounds = array<i64: 1, 2, 1>, scalar_prefetch = 0 : i64, scratch_operands = 1 : i64, tpu.core_type = #tpu.core_type<tc>, window_params = [{transform_indices = @transform_0, window_bounds = array<i64: 1, 128, 128>}, {pipeline_mode = #tpu.pipeline_mode<synchronous>, transform_indices = @transform_1, window_bounds = array<i64: 256, 128>}, {pipeline_mode = #tpu.pipeline_mode<synchronous>, transform_indices = @transform_2, window_bounds = array<i64: 128, 128>}, {transform_indices = @transform_3, window_bounds = array<i64: 1, 128, 128>}]} {
    %c0_i32 = arith.constant 0 : i32
    %0 = arith.cmpi eq, %arg2, %c0_i32 : i32
    %1 = arith.extui %0 : i1 to i32
    %c0_i32_0 = arith.constant 0 : i32
    %2 = arith.cmpi ne, %1, %c0_i32_0 : i32
    scf.if %2 {
      %cst_11 = arith.constant 0.000000e+00 : f32
      %18 = vector.broadcast %cst_11 : f32 to vector<128x128xf32>
      %c0_12 = arith.constant 0 : index
      %c0_13 = arith.constant 0 : index
      %19 = vector.load %arg7[%c0_12, %c0_13] : memref<128x128xf32, #tpu.memory_space<vmem>>, vector<128x128xf32>
      tpu.vector_store %arg7[%c0_12, %c0_13], %18 {strides = array<i32>} : memref<128x128xf32, #tpu.memory_space<vmem>>, vector<128x128xf32>,
    } else {
    }
    %c128_i32 = arith.constant 128 : i32
    %3 = arith.muli %arg1, %c128_i32 : i32
    %c128_i32_1 = arith.constant 128 : i32
    %4 = arith.muli %arg2, %c128_i32_1 : i32
    %5 = arith.addi %3, %4 : i32
    %6 = tpu.assume_multiple %5, 128 : i32
    %7 = arith.index_cast %6 : i32 to index
    %c0 = arith.constant 0 : index
    %8 = vector.load %arg4[%7, %c0] : memref<256x128xbf16, #tpu.memory_space<vmem>>, vector<128x128xbf16>
    %c0_2 = arith.constant 0 : index
    %c0_3 = arith.constant 0 : index
    %9 = vector.load %arg7[%c0_2, %c0_3] : memref<128x128xf32, #tpu.memory_space<vmem>>, vector<128x128xf32>
    %c0_4 = arith.constant 0 : index
    %c0_5 = arith.constant 0 : index
    %c0_6 = arith.constant 0 : index
    %10 = vector.load %arg3[%c0_4, %c0_5, %c0_6] : memref<1x128x128xbf16, #tpu.memory_space<vmem>>, vector<1x128x128xbf16>
    %11 = vector.shape_cast %10 : vector<1x128x128xbf16> to vector<128x128xbf16>
    %cst = arith.constant dense<0.000000e+00> : vector<128x128xf32>
    %12 = tpu.matmul %11, %8, %cst {dimension_numbers = #tpu.dot_dimension_numbers<[1], [0], [0], [1], [0, 0, 1, 1], [], []>} : vector<128x128xbf16>, vector<128x128xbf16>, vector<128x128xf32> -> vector<128x128xf32>
    %13 = arith.addf %9, %12 : vector<128x128xf32>
    %c0_7 = arith.constant 0 : index
    %c0_8 = arith.constant 0 : index
    %14 = vector.load %arg7[%c0_7, %c0_8] : memref<128x128xf32, #tpu.memory_space<vmem>>, vector<128x128xf32>
    tpu.vector_store %arg7[%c0_7, %c0_8], %13 {strides = array<i32>} : memref<128x128xf32, #tpu.memory_space<vmem>>, vector<128x128xf32>,
    %c0_i32_9 = arith.constant 0 : i32
    %15 = arith.cmpi eq, %arg2, %c0_i32_9 : i32
    %16 = arith.extui %15 : i1 to i32
    %c0_i32_10 = arith.constant 0 : i32
    %17 = arith.cmpi ne, %16, %c0_i32_10 : i32
    scf.if %17 {
      %c0_11 = arith.constant 0 : index
      %c0_12 = arith.constant 0 : index
      %18 = vector.load %arg7[%c0_11, %c0_12] : memref<128x128xf32, #tpu.memory_space<vmem>>, vector<128x128xf32>
      %cst_13 = arith.constant 0.000000e+00 : f32
      %19 = vector.broadcast %cst_13 : f32 to vector<128x128xf32>
      %20 = arith.maximumf %18, %19 : vector<128x128xf32>
      %21 = arith.truncf %20 : vector<128x128xf32> to vector<128x128xbf16>
      %c0_14 = arith.constant 0 : index
      %c0_15 = arith.constant 0 : index
      %22 = vector.load %arg5[%c0_14, %c0_15] : memref<128x128xbf16, #tpu.memory_space<vmem>>, vector<128x128xbf16>
      %cst_16 = arith.constant dense<0.000000e+00> : vector<128x128xf32>
      %23 = tpu.matmul %21, %22, %cst_16 {dimension_numbers = #tpu.dot_dimension_numbers<[1], [0], [0], [1], [0, 0, 1, 1], [], []>} : vector<128x128xbf16>, vector<128x128xbf16>, vector<128x128xf32> -> vector<128x128xf32>
      %24 = arith.truncf %23 : vector<128x128xf32> to vector<128x128xbf16>
      %c0_17 = arith.constant 0 : index
      %c0_18 = arith.constant 0 : index
      %c0_19 = arith.constant 0 : index
      %25 = vector.load %arg6[%c0_17, %c0_18, %c0_19] : memref<1x128x128xbf16, #tpu.memory_space<vmem>>, vector<1x128x128xbf16>
      %26 = vector.shape_cast %25 : vector<1x128x128xbf16> to vector<128x128xbf16>
      %27 = vector.shape_cast %24 : vector<128x128xbf16> to vector<1x128x128xbf16>
      tpu.vector_store %arg6[%c0_17, %c0_18, %c0_19], %27 {strides = array<i32>} : memref<1x128x128xbf16, #tpu.memory_space<vmem>>, vector<1x128x128xbf16>,
    } else {
    }
    return
  }
  func.func @transform_0(%arg0: i32, %arg1: i32, %arg2: i32) -> (i32, i32, i32) {
    %c0_i32 = arith.constant 0 : i32
    return %arg1, %arg0, %arg2 : i32, i32, i32
  }
  func.func @transform_1(%arg0: i32, %arg1: i32, %arg2: i32) -> (i32, i32) {
    %c0_i32 = arith.constant 0 : i32
    %c0_i32_0 = arith.constant 0 : i32
    %c0_i32_1 = arith.constant 0 : i32
    return %c0_i32, %c0_i32_0 : i32, i32
  }
  func.func @transform_2(%arg0: i32, %arg1: i32, %arg2: i32) -> (i32, i32) {
    %c0_i32 = arith.constant 0 : i32
    %c0_i32_0 = arith.constant 0 : i32
    %c0_i32_1 = arith.constant 0 : i32
    return %c0_i32, %c0_i32_0 : i32, i32
  }
  func.func @transform_3(%arg0: i32, %arg1: i32, %arg2: i32) -> (i32, i32, i32) {
    %c0_i32 = arith.constant 0 : i32
    %c0_i32_0 = arith.constant 0 : i32
    return %arg1, %arg0, %c0_i32 : i32, i32, i32
  }
}

module attributes {stable_mosaic.version = 11 : i64} {
  func.func @_aggregate_kernel(%arg0: i32, %arg1: i32, %arg2: i32, %arg3: memref<1x128x128xbf16, #tpu.memory_space<vmem>>, %arg4: memref<256x128xbf16, #tpu.memory_space<vmem>>, %arg5: memref<1x128x128xf32, #tpu.memory_space<vmem>>, %arg6: memref<128x128xf32, #tpu.memory_space<vmem>>) attributes {dimension_semantics = [#tpu.dimension_semantics<parallel>, #tpu.dimension_semantics<parallel>, #tpu.dimension_semantics<arbitrary>], iteration_bounds = array<i64: 1, 2, 1>, scalar_prefetch = 0 : i64, scratch_operands = 1 : i64, tpu.core_type = #tpu.core_type<tc>, window_params = [{transform_indices = @transform_0, window_bounds = array<i64: 1, 128, 128>}, {pipeline_mode = #tpu.pipeline_mode<synchronous>, transform_indices = @transform_1, window_bounds = array<i64: 256, 128>}, {transform_indices = @transform_2, window_bounds = array<i64: 1, 128, 128>}]} {
    %c0_i32 = arith.constant 0 : i32
    %0 = arith.cmpi eq, %arg2, %c0_i32 : i32
    %1 = arith.extui %0 : i1 to i32
    %c0_i32_0 = arith.constant 0 : i32
    %2 = arith.cmpi ne, %1, %c0_i32_0 : i32
    scf.if %2 {
      %cst_11 = arith.constant 0.000000e+00 : f32
      %18 = vector.broadcast %cst_11 : f32 to vector<128x128xf32>
      %c0_12 = arith.constant 0 : index
      %c0_13 = arith.constant 0 : index
      %19 = vector.load %arg6[%c0_12, %c0_13] : memref<128x128xf32, #tpu.memory_space<vmem>>, vector<128x128xf32>
      tpu.vector_store %arg6[%c0_12, %c0_13], %18 {strides = array<i32>} : memref<128x128xf32, #tpu.memory_space<vmem>>, vector<128x128xf32>,
    } else {
    }
    %c128_i32 = arith.constant 128 : i32
    %3 = arith.muli %arg1, %c128_i32 : i32
    %c128_i32_1 = arith.constant 128 : i32
    %4 = arith.muli %arg2, %c128_i32_1 : i32
    %5 = arith.addi %3, %4 : i32
    %6 = tpu.assume_multiple %5, 128 : i32
    %7 = arith.index_cast %6 : i32 to index
    %c0 = arith.constant 0 : index
    %8 = vector.load %arg4[%7, %c0] : memref<256x128xbf16, #tpu.memory_space<vmem>>, vector<128x128xbf16>
    %c0_2 = arith.constant 0 : index
    %c0_3 = arith.constant 0 : index
    %9 = vector.load %arg6[%c0_2, %c0_3] : memref<128x128xf32, #tpu.memory_space<vmem>>, vector<128x128xf32>
    %c0_4 = arith.constant 0 : index
    %c0_5 = arith.constant 0 : index
    %c0_6 = arith.constant 0 : index
    %10 = vector.load %arg3[%c0_4, %c0_5, %c0_6] : memref<1x128x128xbf16, #tpu.memory_space<vmem>>, vector<1x128x128xbf16>
    %11 = vector.shape_cast %10 : vector<1x128x128xbf16> to vector<128x128xbf16>
    %cst = arith.constant dense<0.000000e+00> : vector<128x128xf32>
    %12 = tpu.matmul %11, %8, %cst {dimension_numbers = #tpu.dot_dimension_numbers<[1], [0], [0], [1], [0, 0, 1, 1], [], []>} : vector<128x128xbf16>, vector<128x128xbf16>, vector<128x128xf32> -> vector<128x128xf32>
    %13 = arith.addf %9, %12 : vector<128x128xf32>
    %c0_7 = arith.constant 0 : index
    %c0_8 = arith.constant 0 : index
    %14 = vector.load %arg6[%c0_7, %c0_8] : memref<128x128xf32, #tpu.memory_space<vmem>>, vector<128x128xf32>
    tpu.vector_store %arg6[%c0_7, %c0_8], %13 {strides = array<i32>} : memref<128x128xf32, #tpu.memory_space<vmem>>, vector<128x128xf32>,
    %c0_i32_9 = arith.constant 0 : i32
    %15 = arith.cmpi eq, %arg2, %c0_i32_9 : i32
    %16 = arith.extui %15 : i1 to i32
    %c0_i32_10 = arith.constant 0 : i32
    %17 = arith.cmpi ne, %16, %c0_i32_10 : i32
    scf.if %17 {
      %c0_11 = arith.constant 0 : index
      %c0_12 = arith.constant 0 : index
      %18 = vector.load %arg6[%c0_11, %c0_12] : memref<128x128xf32, #tpu.memory_space<vmem>>, vector<128x128xf32>
      %c0_13 = arith.constant 0 : index
      %c0_14 = arith.constant 0 : index
      %c0_15 = arith.constant 0 : index
      %19 = vector.load %arg5[%c0_13, %c0_14, %c0_15] : memref<1x128x128xf32, #tpu.memory_space<vmem>>, vector<1x128x128xf32>
      %20 = vector.shape_cast %19 : vector<1x128x128xf32> to vector<128x128xf32>
      %21 = vector.shape_cast %18 : vector<128x128xf32> to vector<1x128x128xf32>
      tpu.vector_store %arg5[%c0_13, %c0_14, %c0_15], %21 {strides = array<i32>} : memref<1x128x128xf32, #tpu.memory_space<vmem>>, vector<1x128x128xf32>,
    } else {
    }
    return
  }
  func.func @transform_0(%arg0: i32, %arg1: i32, %arg2: i32) -> (i32, i32, i32) {
    %c0_i32 = arith.constant 0 : i32
    return %arg1, %arg0, %arg2 : i32, i32, i32
  }
  func.func @transform_1(%arg0: i32, %arg1: i32, %arg2: i32) -> (i32, i32) {
    %c0_i32 = arith.constant 0 : i32
    %c0_i32_0 = arith.constant 0 : i32
    %c0_i32_1 = arith.constant 0 : i32
    return %c0_i32, %c0_i32_0 : i32, i32
  }
  func.func @transform_2(%arg0: i32, %arg1: i32, %arg2: i32) -> (i32, i32, i32) {
    %c0_i32 = arith.constant 0 : i32
    %c0_i32_0 = arith.constant 0 : i32
    return %arg1, %arg0, %c0_i32 : i32, i32, i32
  }
}

</mosaic_0001>

<bundles_post_ra>
// kernel: gcn_forward.3
= control target key start
LH: loop header
LB: loop body
LE: loop exit
PB: predicated region body
PF: predicated region fallthrough
CT: control target
= control target key end

     0   :  { %s726_s9 = smov 0   ;;  %s784_s0 = inlined_call_operand.vmem [shape: bf16[256,128], index: 0, kind: input, shape index: {}]   ;;  %s785_s1 = inlined_call_operand.vmem [shape: bf16[128,128], index: 1, kind: input, shape index: {}]   ;;  %s786_s2 = inlined_call_operand.vmem [shape: bf16[256,128], index: 2, kind: output, shape index: {}]  }
   0x1 LB: > { %s509_s10 = sadd.s32 4294967295, %s709_s9   ;;  %p513_p0 = scmp.ge.s32.totalorder %s709_s9, 1  ;;  %s709_s9 = sphi %s726_s9, %s12_s9  }
   0x2   : > { %p113_p1 = scmp.lt.s32.totalorder %s709_s9, 3 }
   0x4   : > { %p114_p2 = pnand %p513_p0, %p113_p1 }
   0x5   : > { %s514_s13 = sshll.u32 (!%p114_p2), %s509_s10, 4 }
   0x6   : > { %117 = sbr.rel (%p114_p2) target bundleno = 254 (0xfe), region = 28  ;;  %p136_p3 = scmp.lt.s32.totalorder (!%p114_p2), %s514_s13, 31 }
   0xb   : > { %v687_v0 = vld [vmem:[%s785_s1 + $0x38] sm:$0xff]   ;;  %v688_v1 = vld [vmem:[%s785_s1 + $0x30] sm:$0xff]   ;;  %s788_s13 = smov (!%p136_p3, %s514_s13), 31  ;;  %v689_v2 = vld [vmem:[%s785_s1 + $0x28] sm:$0xff]  }
   0xc   : > { %631 = vmatprep.subr.bf16.mxu0 %v687_v0  ;;  %663 = vmatprep.subr.bf16.mxu1 %v687_v0  ;;  %s515_s18 = sshll.u32 %s788_s13, 2  ;;  %v690_v3 = vld [vmem:[%s785_s1 + $0x20] sm:$0xff]   ;;  %v691_v6 = vld [vmem:[%s785_s1 + $0x18] sm:$0xff]   ;;  %v692_v7 = vld [vmem:[%s785_s1 + $0x10] sm:$0xff]  }
   0xd   : > { %632 = vmatpush3.bf16.msra.mxu0 %v687_v0  ;;  %671 = vmatpush3.bf16.msra.mxu1 %v687_v0  ;;  %s751_s21 = scalar_lea.vmem %s784_s0, %s515_s18  ;;  %v693_v8 = vld [vmem:[%s785_s1 + $0x8] sm:$0xff]   ;;  %v694_v9 = vld [vmem:[%s785_s1] sm:$0xff]   ;;  %s145_s6 = scalar_lea.vmem %s786_s2, %s515_s18 }
   0xe   : > { %633 = vmatprep.subr.bf16.mxu0 %v688_v1  ;;  %664 = vmatprep.subr.bf16.mxu1 %v688_v1  ;;  %v695_v4 = vld [vmem:[%s751_s21] sm:$0xff]   ;;  %v697_v10 = vld [vmem:[%s751_s21 + $0x8] sm:$0xff]   ;;  %v699_v12 = vld [vmem:[%s751_s21 + $0x10] sm:$0xff]  }
   0xf   : > { %v696_v5 = vld [vmem:[%s751_s21 + $0x20] sm:$0xff]   ;;  %647 = vmatprep.mubr.bf16.mxu0 %v695_v4  ;;  %v698_v11 = vld [vmem:[%s751_s21 + $0x28] sm:$0xff]   ;;  %v700_v13 = vld [vmem:[%s751_s21 + $0x30] sm:$0xff]  }
  0x10   : > { %655 = vmatprep.mubr.bf16.mxu1 %v696_v5  ;;  %v701_v14 = vld [vmem:[%s751_s21 + $0x18] sm:$0xff]  }
  0x11   : > { %634 = vmatpush3.bf16.msra.mxu0 %v688_v1  ;;  %672 = vmatpush3.bf16.msra.mxu1 %v688_v1  ;;  %v702_v15 = vld [vmem:[%s751_s21 + $0x38] sm:$0xff]  }
  0x12   : > { %635 = vmatprep.subr.bf16.mxu0 %v689_v2  ;;  %665 = vmatprep.subr.bf16.mxu1 %v689_v2 }
  0x15   : > { %636 = vmatpush3.bf16.msra.mxu0 %v689_v2  ;;  %673 = vmatpush3.bf16.msra.mxu1 %v689_v2 }
  0x16   : > { %637 = vmatprep.subr.bf16.mxu0 %v690_v3  ;;  %666 = vmatprep.subr.bf16.mxu1 %v690_v3 }
  0x19   : > { %638 = vmatpush3.bf16.msra.mxu0 %v690_v3  ;;  %674 = vmatpush3.bf16.msra.mxu1 %v690_v3 }
  0x1a   : > { %639 = vmatprep.subr.bf16.mxu0 %v691_v6  ;;  %667 = vmatprep.subr.bf16.mxu1 %v691_v6 }
  0x1d   : > { %640 = vmatpush3.bf16.msra.mxu0 %v691_v6  ;;  %675 = vmatpush3.bf16.msra.mxu1 %v691_v6 }
  0x1e   : > { %641 = vmatprep.subr.bf16.mxu0 %v692_v7  ;;  %668 = vmatprep.subr.bf16.mxu1 %v692_v7 }
  0x21   : > { %642 = vmatpush3.bf16.msra.mxu0 %v692_v7  ;;  %676 = vmatpush3.bf16.msra.mxu1 %v692_v7 }
  0x22   : > { %643 = vmatprep.subr.bf16.mxu0 %v693_v8  ;;  %669 = vmatprep.subr.bf16.mxu1 %v693_v8 }
  0x25   : > { %644 = vmatpush3.bf16.msra.mxu0 %v693_v8  ;;  %677 = vmatpush3.bf16.msra.mxu1 %v693_v8 }
  0x26   : > { %645 = vmatprep.subr.bf16.mxu0 %v694_v9  ;;  %670 = vmatprep.subr.bf16.mxu1 %v694_v9 }
  0x29   : > { %646 = vmatpush3.bf16.msra.mxu0 %v694_v9  ;;  %678 = vmatpush3.bf16.msra.mxu1 %v694_v9 }
  0x2c   : > { %648 = vmatmul.mubr.bf16.vlgmr.msra.gmra.mxu0 %v697_v10  ;;  %656 = vmatmul.mubr.bf16.vlgmr.msra.gmra.mxu1 %v698_v11 }
  0x2d   : > { %651 = vmatprep.mubr.bf16.mxu0 %v699_v12  ;;  %659 = vmatprep.mubr.bf16.mxu1 %v700_v13 }
  0x34   : > { %652 = vmatmul.mubr.bf16.gmra.mxu0 %v701_v14  ;;  %660 = vmatmul.mubr.bf16.gmra.mxu1 %v702_v15 }
  0xec   : > { %v649_v16 = vpop.f32.mrf.mxu0  ;;  %v657_v17 = vpop.f32.mrf.mxu1 }
  0xee   : > { %v310_v18 = vpop.f32.mrf.mxu0  ;;  %v342_v19 = vpop.f32.mrf.mxu1 }
  0xf0   : > { %v650_v20 = vpop.f32.mrf.mxu0  ;;  %v658_v21 = vpop.f32.mrf.mxu1 }
  0xf1   : > { %v576_v22 = vpack.c.bf16 %v650_v20, %v649_v16  ;;  %v596_v23 = vpack.c.bf16 %v658_v21, %v657_v17 }
  0xf2   : > { %v313_v24 = vpop.f32.mrf.mxu0  ;;  %v345_v25 = vpop.f32.mrf.mxu1 }
  0xf3   : > { %608 = vst [vmem:[%s145_s6 + $0x8] sm:$0xff] %v576_v22   ;;  %612 = vst [vmem:[%s145_s6 + $0x28] sm:$0xff] %v596_v23   ;;  %v571_v26 = vpack.c.bf16 %v313_v24, %v310_v18  ;;  %v591_v27 = vpack.c.bf16 %v345_v25, %v342_v19 }
  0xf4   : > { %v653_v28 = vpop.f32.mrf.mxu0  ;;  %v661_v29 = vpop.f32.mrf.mxu1 }
  0xf5   : > { %572 = vst [vmem:[%s145_s6] sm:$0xff] %v571_v26   ;;  %611 = vst [vmem:[%s145_s6 + $0x20] sm:$0xff] %v591_v27  }
  0xf6   : > { %v326_v30 = vpop.f32.mrf.mxu0  ;;  %v358_v31 = vpop.f32.mrf.mxu1 }
  0xf8   : > { %v654_v32 = vpop.f32.mrf.mxu0  ;;  %v662_v33 = vpop.f32.mrf.mxu1 }
  0xf9   : > { %v586_v34 = vpack.c.bf16 %v654_v32, %v653_v28  ;;  %v606_v35 = vpack.c.bf16 %v662_v33, %v661_v29 }
  0xfa   : > { %v329_v36 = vpop.f32.mrf.mxu0  ;;  %v361_v37 = vpop.f32.mrf.mxu1 }
  0xfb   : > { %610 = vst [vmem:[%s145_s6 + $0x18] sm:$0xff] %v586_v34   ;;  %614 = vst [vmem:[%s145_s6 + $0x38] sm:$0xff] %v606_v35   ;;  %v581_v38 = vpack.c.bf16 %v329_v36, %v326_v30  ;;  %v601_v39 = vpack.c.bf16 %v361_v37, %v358_v31 }
  0xfd   : > { %609 = vst [vmem:[%s145_s6 + $0x10] sm:$0xff] %v581_v38   ;;  %613 = vst [vmem:[%s145_s6 + $0x30] sm:$0xff] %v601_v39  }
  0xfe PF: > { %s12_s9 = sadd.s32 1, %s709_s9  }
  0xff   : > { %p9_p4 = scmp.ge.s32.totalorder %s12_s9, 4  }
 0x101   :  { %11 = sbr.rel (!%p9_p4) target bundleno = 1 (0x1), region = 58 }

// kernel: gcn_forward.5
= control target key start
LH: loop header
LB: loop body
LE: loop exit
PB: predicated region body
PF: predicated region fallthrough
CT: control target
= control target key end

     0   :  { %s806_s9 = smov 0   ;;  %s808_s10 = smov 0   ;;  %s884_s0 = inlined_call_operand.vmem [shape: bf16[2,128,128], index: 0, kind: input, shape index: {}]   ;;  %s885_s1 = inlined_call_operand.vmem [shape: bf16[256,128], index: 1, kind: input, shape index: {}]   ;;  %s886_s2 = inlined_call_operand.vmem [shape: f32[2,128,128], index: 2, kind: output, shape index: {}]  }
   0x1   :  { %s810_s11 = smov 0  }
   0x2 LB: > { %s27_s12 = sadd.s32 1, %s785_s10  ;;  %p636_p0 = scmp.ge.s32.totalorder %s789_s11, 1  ;;  %s789_s11 = sphi %s810_s11, %s12_s11   ;;  %s785_s10 = sphi %s808_s10, %s888_s10   ;;  %s781_s9 = sphi %s806_s9, %s887_s9  }
   0x3   : > { %p29_p1 = scmp.ge.s32.totalorder %s27_s12, 2  ;;  %p145_p2 = scmp.lt.s32.totalorder %s789_s11, 3 }
   0x5   : > { %s890_s12 = smov (%p29_p1, %s27_s12), 0  ;;  %p146_p3 = pnand %p636_p0, %p145_p2 }
   0x6   : > { %s641_s13 = sshll.u32 (!%p146_p3), %s781_s9, 7  ;;  %p179_p4 = scmp.lt.s32.totalorder (!%p146_p3), %s781_s9, 1 }
   0x7   : > { %149 = sbr.rel (%p146_p3) target bundleno = 253 (0xfd), region = 28  ;;  %s225_s14 = sshra.s32 (!%p146_p3), %s641_s13, 3 }
   0x8   : > { %s642_s15 = sshll.u32 (!%p146_p3), %s225_s14, 2 }
   0x9   : > { %s827_s18 = scalar_lea.vmem (!%p146_p3), %s885_s1, %s642_s15 }
   0xc   : > { %v751_v0 = vld [vmem:[%s827_s18 + $0x38] sm:$0xff]   ;;  %s892_s9 = smov (!%p179_p4, %s781_s9), 1  ;;  %v752_v1 = vld [vmem:[%s827_s18 + $0x30] sm:$0xff]   ;;  %v753_v2 = vld [vmem:[%s827_s18 + $0x28] sm:$0xff]  }
   0xd   : > { %679 = vmatprep.subr.bf16.mxu0 %v751_v0  ;;  %711 = vmatprep.subr.bf16.mxu1 %v751_v0  ;;  %s661_s19 = sshll.u32 %s892_s9, 6  ;;  %v754_v3 = vld [vmem:[%s827_s18 + $0x20] sm:$0xff]   ;;  %v755_v6 = vld [vmem:[%s827_s18 + $0x18] sm:$0xff]   ;;  %v756_v7 = vld [vmem:[%s827_s18 + $0x10] sm:$0xff]   ;;  %s662_s23 = sshll.u32 %s892_s9, 7 }
   0xe   : > { %680 = vmatpush3.bf16.msra.mxu0 %v751_v0  ;;  %719 = vmatpush3.bf16.msra.mxu1 %v751_v0  ;;  %s838_s22 = scalar_lea.vmem %s884_s0, %s661_s19  ;;  %v757_v8 = vld [vmem:[%s827_s18 + $0x8] sm:$0xff]   ;;  %v758_v9 = vld [vmem:[%s827_s18] sm:$0xff]   ;;  %s857_s26 = scalar_lea.vmem %s886_s2, %s662_s23 }
   0xf   : > { %681 = vmatprep.subr.bf16.mxu0 %v752_v1  ;;  %712 = vmatprep.subr.bf16.mxu1 %v752_v1  ;;  %v759_v4 = vld [vmem:[%s838_s22] sm:$0xff]   ;;  %v761_v10 = vld [vmem:[%s838_s22 + $0x8] sm:$0xff]   ;;  %v763_v12 = vld [vmem:[%s838_s22 + $0x10] sm:$0xff]  }
  0x10   : > { %v760_v5 = vld [vmem:[%s838_s22 + $0x20] sm:$0xff]   ;;  %695 = vmatprep.mubr.bf16.mxu0 %v759_v4  ;;  %v762_v11 = vld [vmem:[%s838_s22 + $0x28] sm:$0xff]   ;;  %v764_v13 = vld [vmem:[%s838_s22 + $0x30] sm:$0xff]  }
  0x11   : > { %703 = vmatprep.mubr.bf16.mxu1 %v760_v5  ;;  %v765_v14 = vld [vmem:[%s838_s22 + $0x18] sm:$0xff]  }
  0x12   : > { %682 = vmatpush3.bf16.msra.mxu0 %v752_v1  ;;  %720 = vmatpush3.bf16.msra.mxu1 %v752_v1  ;;  %v766_v15 = vld [vmem:[%s838_s22 + $0x38] sm:$0xff]  }
  0x13   : > { %683 = vmatprep.subr.bf16.mxu0 %v753_v2  ;;  %713 = vmatprep.subr.bf16.mxu1 %v753_v2 }
  0x16   : > { %684 = vmatpush3.bf16.msra.mxu0 %v753_v2  ;;  %721 = vmatpush3.bf16.msra.mxu1 %v753_v2 }
  0x17   : > { %685 = vmatprep.subr.bf16.mxu0 %v754_v3  ;;  %714 = vmatprep.subr.bf16.mxu1 %v754_v3 }
  0x1a   : > { %686 = vmatpush3.bf16.msra.mxu0 %v754_v3  ;;  %722 = vmatpush3.bf16.msra.mxu1 %v754_v3 }
  0x1b   : > { %687 = vmatprep.subr.bf16.mxu0 %v755_v6  ;;  %715 = vmatprep.subr.bf16.mxu1 %v755_v6 }
  0x1e   : > { %688 = vmatpush3.bf16.msra.mxu0 %v755_v6  ;;  %723 = vmatpush3.bf16.msra.mxu1 %v755_v6 }
  0x1f   : > { %689 = vmatprep.subr.bf16.mxu0 %v756_v7  ;;  %716 = vmatprep.subr.bf16.mxu1 %v756_v7 }
  0x22   : > { %690 = vmatpush3.bf16.msra.mxu0 %v756_v7  ;;  %724 = vmatpush3.bf16.msra.mxu1 %v756_v7 }
  0x23   : > { %691 = vmatprep.subr.bf16.mxu0 %v757_v8  ;;  %717 = vmatprep.subr.bf16.mxu1 %v757_v8 }
  0x26   : > { %692 = vmatpush3.bf16.msra.mxu0 %v757_v8  ;;  %725 = vmatpush3.bf16.msra.mxu1 %v757_v8 }
  0x27   : > { %693 = vmatprep.subr.bf16.mxu0 %v758_v9  ;;  %718 = vmatprep.subr.bf16.mxu1 %v758_v9 }
  0x2a   : > { %694 = vmatpush3.bf16.msra.mxu0 %v758_v9  ;;  %726 = vmatpush3.bf16.msra.mxu1 %v758_v9 }
  0x2d   : > { %696 = vmatmul.mubr.bf16.vlgmr.msra.gmra.mxu0 %v761_v10  ;;  %704 = vmatmul.mubr.bf16.vlgmr.msra.gmra.mxu1 %v762_v11 }
  0x2e   : > { %699 = vmatprep.mubr.bf16.mxu0 %v763_v12  ;;  %707 = vmatprep.mubr.bf16.mxu1 %v764_v13 }
  0x35   : > { %700 = vmatmul.mubr.bf16.gmra.mxu0 %v765_v14  ;;  %708 = vmatmul.mubr.bf16.gmra.mxu1 %v766_v15 }
  0xed   : > { %v697_v16 = vpop.f32.mrf.mxu0  ;;  %v705_v17 = vpop.f32.mrf.mxu1 }
  0xee   : > { %523 = vst [vmem:[%s857_s26 + $0x10] sm:$0xff] %v697_v16  ;;  %531 = vst [vmem:[%s857_s26 + $0x50] sm:$0xff] %v705_v17 }
  0xef   : > { %v407_v18 = vpop.f32.mrf.mxu0  ;;  %v439_v19 = vpop.f32.mrf.mxu1 }
  0xf0   : > { %521 = vst [vmem:[%s857_s26] sm:$0xff] %v407_v18  ;;  %529 = vst [vmem:[%s857_s26 + $0x40] sm:$0xff] %v439_v19 }
  0xf1   : > { %v698_v20 = vpop.f32.mrf.mxu0  ;;  %v706_v21 = vpop.f32.mrf.mxu1 }
  0xf2   : > { %524 = vst [vmem:[%s857_s26 + $0x18] sm:$0xff] %v698_v20  ;;  %532 = vst [vmem:[%s857_s26 + $0x58] sm:$0xff] %v706_v21 }
  0xf3   : > { %v410_v22 = vpop.f32.mrf.mxu0  ;;  %v442_v23 = vpop.f32.mrf.mxu1 }
  0xf4   : > { %522 = vst [vmem:[%s857_s26 + $0x8] sm:$0xff] %v410_v22  ;;  %530 = vst [vmem:[%s857_s26 + $0x48] sm:$0xff] %v442_v23 }
  0xf5   : > { %v701_v24 = vpop.f32.mrf.mxu0  ;;  %v709_v25 = vpop.f32.mrf.mxu1 }
  0xf6   : > { %527 = vst [vmem:[%s857_s26 + $0x30] sm:$0xff] %v701_v24  ;;  %535 = vst [vmem:[%s857_s26 + $0x70] sm:$0xff] %v709_v25 }
  0xf7   : > { %v423_v26 = vpop.f32.mrf.mxu0  ;;  %v455_v27 = vpop.f32.mrf.mxu1 }
  0xf8   : > { %525 = vst [vmem:[%s857_s26 + $0x20] sm:$0xff] %v423_v26  ;;  %533 = vst [vmem:[%s857_s26 + $0x60] sm:$0xff] %v455_v27 }
  0xf9   : > { %v702_v28 = vpop.f32.mrf.mxu0  ;;  %v710_v29 = vpop.f32.mrf.mxu1 }
  0xfa   : > { %528 = vst [vmem:[%s857_s26 + $0x38] sm:$0xff] %v702_v28  ;;  %536 = vst [vmem:[%s857_s26 + $0x78] sm:$0xff] %v710_v29 }
  0xfb   : > { %v426_v30 = vpop.f32.mrf.mxu0  ;;  %v458_v31 = vpop.f32.mrf.mxu1 }
  0xfc   : > { %526 = vst [vmem:[%s857_s26 + $0x28] sm:$0xff] %v426_v30  ;;  %534 = vst [vmem:[%s857_s26 + $0x68] sm:$0xff] %v458_v31 }
  0xfd PF: > { %s12_s11 = sadd.s32 1, %s789_s11   ;;  %s887_s9 = smov %s785_s10 }
  0xfe   : > { %p9_p5 = scmp.ge.s32.totalorder %s12_s11, 4   ;;  %s888_s10 = smov %s890_s12 }
 0x100   :  { %11 = sbr.rel (!%p9_p5) target bundleno = 2 (0x2), region = 67 }

// kernel: gcn_forward.4
= control target key start
LH: loop header
LB: loop body
LE: loop exit
PB: predicated region body
PF: predicated region fallthrough
CT: control target
= control target key end

     0   :  { %s1214_s12 = smov 0   ;;  %s1216_s13 = smov 0   ;;  %s1301_s0 = inlined_call_operand.vmem [shape: bf16[2,128,128], index: 0, kind: input, shape index: {}]   ;;  %s1302_s1 = inlined_call_operand.vmem [shape: bf16[256,128], index: 1, kind: input, shape index: {}]   ;;  %s1303_s2 = inlined_call_operand.vmem [shape: bf16[128,128], index: 2, kind: input, shape index: {}]   ;;  %s1304_s3 = inlined_call_operand.vmem [shape: bf16[2,128,128], index: 3, kind: output, shape index: {}]  }
   0x1   :  { %s1218_s14 = smov 0  }
   0x2 LB: > { %s28_s15 = sadd.s32 1, %s1188_s13  ;;  %p912_p0 = scmp.ge.s32.totalorder %s1192_s14, 1  ;;  %s1192_s14 = sphi %s1218_s14, %s13_s14   ;;  %s1188_s13 = sphi %s1216_s13, %s1306_s13   ;;  %s1184_s12 = sphi %s1214_s12, %s1305_s12  }
   0x3   : > { %p30_p1 = scmp.ge.s32.totalorder %s28_s15, 2  ;;  %p170_p2 = scmp.lt.s32.totalorder %s1192_s14, 3 }
   0x5   : > { %s1308_s15 = smov (%p30_p1, %s28_s15), 0  ;;  %p171_p3 = pnand %p912_p0, %p170_p2 }
   0x6   : > { %s917_s16 = sshll.u32 (!%p171_p3), %s1184_s12, 7  ;;  %p206_p4 = scmp.lt.s32.totalorder (!%p171_p3), %s1184_s12, 1 }
   0x7   : > { %174 = sbr.rel (%p171_p3) target bundleno = 476 (0x1dc), region = 32  ;;  %s252_s17 = sshra.s32 (!%p171_p3), %s917_s16, 3 }
   0x8   : > { %s918_s20 = sshll.u32 (!%p171_p3), %s252_s17, 2 }
   0x9   : > { %s1241_s25 = scalar_lea.vmem (!%p171_p3), %s1302_s1, %s918_s20 }
   0xc   : > { %v1162_v0 = vld [vmem:[%s1303_s2 + $0x38] sm:$0xff]   ;;  %v1163_v1 = vld [vmem:[%s1303_s2 + $0x30] sm:$0xff]   ;;  %v1164_v2 = vld [vmem:[%s1303_s2 + $0x28] sm:$0xff]   ;;  %s1310_s12 = smov (!%p206_p4, %s1184_s12), 1 }
   0xd   : > { %1090 = vmatprep.subr.bf16.mxu1 %v1162_v0  ;;  %v1146_v3 = vld [vmem:[%s1241_s25 + $0x38] sm:$0xff]   ;;  %v1147_v4 = vld [vmem:[%s1241_s25 + $0x30] sm:$0xff]   ;;  %s961_s28 = sshll.u32 %s1310_s12, 6  ;;  %v1148_v5 = vld [vmem:[%s1241_s25 + $0x28] sm:$0xff]  }
   0xe   : > { %1091 = vmatpush3.bf16.msra.mxu1 %v1162_v0  ;;  %1058 = vmatprep.subr.bf16.mxu0 %v1146_v3  ;;  %s1257_s4 = scalar_lea.vmem %s1301_s0, %s961_s28  ;;  %v1149_v6 = vld [vmem:[%s1241_s25 + $0x20] sm:$0xff]   ;;  %v1150_v8 = vld [vmem:[%s1241_s25 + $0x18] sm:$0xff]   ;;  %v1151_v9 = vld [vmem:[%s1241_s25 + $0x10] sm:$0xff]   ;;  %s226_s21 = scalar_lea.vmem %s1304_s3, %s961_s28 }
   0xf   : > { %1092 = vmatprep.subr.bf16.mxu1 %v1163_v1  ;;  %1059 = vmatpush3.bf16.msra.mxu0 %v1146_v3  ;;  %v1154_v7 = vld [vmem:[%s1257_s4] sm:$0xff]   ;;  %v1166_v11 = vld [vmem:[%s1303_s2 + $0x18] sm:$0xff]   ;;  %v1152_v12 = vld [vmem:[%s1241_s25 + $0x8] sm:$0xff]  }
  0x10   : > { %1060 = vmatprep.subr.bf16.mxu0 %v1147_v4  ;;  %1074 = vmatprep.mubr.bf16.mxu0 %v1154_v7  ;;  %v1165_v10 = vld [vmem:[%s1303_s2 + $0x20] sm:$0xff]   ;;  %v1155_v14 = vld [vmem:[%s1257_s4 + $0x8] sm:$0xff]   ;;  %v1156_v15 = vld [vmem:[%s1257_s4 + $0x10] sm:$0xff]  }
  0x11   : > { %v1153_v13 = vld [vmem:[%s1241_s25] sm:$0xff]   ;;  %v1157_v16 = vld [vmem:[%s1257_s4 + $0x18] sm:$0xff]   ;;  %v1159_v18 = vld [vmem:[%s1257_s4 + $0x28] sm:$0xff]  }
  0x12   : > { %1093 = vmatpush3.bf16.msra.mxu1 %v1163_v1  ;;  %v1158_v17 = vld [vmem:[%s1257_s4 + $0x20] sm:$0xff]   ;;  %v1160_v19 = vld [vmem:[%s1257_s4 + $0x30] sm:$0xff]   ;;  %v1161_v20 = vld [vmem:[%s1257_s4 + $0x38] sm:$0xff]  }
  0x13   : > { %1094 = vmatprep.subr.bf16.mxu1 %v1164_v2  ;;  %1061 = vmatpush3.bf16.msra.mxu0 %v1147_v4  ;;  %v1167_v21 = vld [vmem:[%s1303_s2 + $0x10] sm:$0xff]   ;;  %v1168_v22 = vld [vmem:[%s1303_s2 + $0x8] sm:$0xff]   ;;  %v1169_v23 = vld [vmem:[%s1303_s2] sm:$0xff]  }
  0x14   : > { %1062 = vmatprep.subr.bf16.mxu0 %v1148_v5 }
  0x16   : > { %1095 = vmatpush3.bf16.msra.mxu1 %v1164_v2 }
  0x17   : > { %1063 = vmatpush3.bf16.msra.mxu0 %v1148_v5  ;;  %1096 = vmatprep.subr.bf16.mxu1 %v1165_v10 }
  0x18   : > { %1064 = vmatprep.subr.bf16.mxu0 %v1149_v6 }
  0x1a   : > { %1097 = vmatpush3.bf16.msra.mxu1 %v1165_v10 }
  0x1b   : > { %1065 = vmatpush3.bf16.msra.mxu0 %v1149_v6  ;;  %1098 = vmatprep.subr.bf16.mxu1 %v1166_v11 }
  0x1c   : > { %1066 = vmatprep.subr.bf16.mxu0 %v1150_v8 }
  0x1e   : > { %1099 = vmatpush3.bf16.msra.mxu1 %v1166_v11 }
  0x1f   : > { %1067 = vmatpush3.bf16.msra.mxu0 %v1150_v8  ;;  %1100 = vmatprep.subr.bf16.mxu1 %v1167_v21 }
  0x20   : > { %1068 = vmatprep.subr.bf16.mxu0 %v1151_v9 }
  0x22   : > { %1101 = vmatpush3.bf16.msra.mxu1 %v1167_v21 }
  0x23   : > { %1069 = vmatpush3.bf16.msra.mxu0 %v1151_v9  ;;  %1102 = vmatprep.subr.bf16.mxu1 %v1168_v22 }
  0x24   : > { %1070 = vmatprep.subr.bf16.mxu0 %v1152_v12 }
  0x26   : > { %1103 = vmatpush3.bf16.msra.mxu1 %v1168_v22 }
  0x27   : > { %1071 = vmatpush3.bf16.msra.mxu0 %v1152_v12  ;;  %1104 = vmatprep.subr.bf16.mxu1 %v1169_v23 }
  0x28   : > { %1072 = vmatprep.subr.bf16.mxu0 %v1153_v13 }
  0x2a   : > { %1105 = vmatpush3.bf16.msra.mxu1 %v1169_v23 }
  0x2b   : > { %1073 = vmatpush3.bf16.msra.mxu0 %v1153_v13 }
  0x2e   : > { %1075 = vmatmul.mubr.bf16.vlgmr.msra.gmra.mxu0 %v1155_v14 }
  0x2f   : > { %1078 = vmatprep.mubr.bf16.mxu0 %v1156_v15 }
  0x36   : > { %1079 = vmatmul.mubr.bf16.gmra.mxu0 %v1157_v16 }
  0x37   : > { %1082 = vmatprep.mubr.bf16.mxu0 %v1158_v17 }
  0x3e   : > { %1083 = vmatmul.mubr.bf16.gmra.mxu0 %v1159_v18 }
  0x3f   : > { %1086 = vmatprep.mubr.bf16.mxu0 %v1160_v19 }
  0x46   : > { %1087 = vmatmul.mubr.bf16.gmra.mxu0 %v1161_v20 }
  0xee   : > { %v1076_v24 = vpop.f32.mrf.mxu0 }
  0xef   : > { %v550_v31 = vmax.f32 %v1076_v24, 0.0 }
  0xf0   : > { %v434_v25 = vpop.f32.mrf.mxu0 }
  0xf1   : > { %v548_v29 = vmax.f32 %v434_v25, 0.0 }
  0xf2   : > { %v1077_v26 = vpop.f32.mrf.mxu0 }
  0xf3   : > { %v551_v27 = vmax.f32 %v1077_v26, 0.0 }
  0xf4   : > { %v437_v28 = vpop.f32.mrf.mxu0 }
  0xf5   : > { %v549_v30 = vmax.f32 %v437_v28, 0.0  ;;  %v565_v34 = vpack.c.bf16 %v551_v27, %v550_v31 }
  0xf6   : > { %v1080_v32 = vpop.f32.mrf.mxu0 }
  0xf7   : > { %v564_v33 = vpack.c.bf16 %v549_v30, %v548_v29  ;;  %v554_v41 = vmax.f32 %v1080_v32, 0.0 }
  0xf8   : > { %v450_v35 = vpop.f32.mrf.mxu0 }
  0xf9   : > { %1106 = vmatprep.mubr.bf16.mxu1 %v564_v33  ;;  %v552_v39 = vmax.f32 %v450_v35, 0.0 }
  0xfa   : > { %v1081_v36 = vpop.f32.mrf.mxu0  ;;  %1107 = vmatmul.mubr.bf16.vlgmr.msra.gmra.mxu1 %v565_v34 }
  0xfb   : > { %v555_v37 = vmax.f32 %v1081_v36, 0.0 }
  0xfc   : > { %v453_v38 = vpop.f32.mrf.mxu0 }
  0xfd   : > { %v553_v40 = vmax.f32 %v453_v38, 0.0  ;;  %v567_v44 = vpack.c.bf16 %v555_v37, %v554_v41 }
  0xfe   : > { %v1084_v42 = vpop.f32.mrf.mxu0 }
  0xff   : > { %v566_v43 = vpack.c.bf16 %v553_v40, %v552_v39  ;;  %v558_v51 = vmax.f32 %v1084_v42, 0.0 }
 0x100   : > { %v466_v45 = vpop.f32.mrf.mxu0 }
 0x101   : > { %1110 = vmatprep.mubr.bf16.mxu1 %v566_v43  ;;  %v556_v49 = vmax.f32 %v466_v45, 0.0 }
 0x102   : > { %v1085_v46 = vpop.f32.mrf.mxu0  ;;  %1111 = vmatmul.mubr.bf16.gmra.mxu1 %v567_v44 }
 0x103   : > { %v559_v47 = vmax.f32 %v1085_v46, 0.0 }
 0x104   : > { %v469_v48 = vpop.f32.mrf.mxu0 }
 0x105   : > { %v557_v50 = vmax.f32 %v469_v48, 0.0  ;;  %v569_v54 = vpack.c.bf16 %v559_v47, %v558_v51 }
 0x106   : > { %v1088_v52 = vpop.f32.mrf.mxu0 }
 0x107   : > { %v568_v53 = vpack.c.bf16 %v557_v50, %v556_v49  ;;  %v562_v61 = vmax.f32 %v1088_v52, 0.0 }
 0x108   : > { %v482_v55 = vpop.f32.mrf.mxu0 }
 0x109   : > { %1114 = vmatprep.mubr.bf16.mxu1 %v568_v53  ;;  %v560_v59 = vmax.f32 %v482_v55, 0.0 }
 0x10a   : > { %v1089_v56 = vpop.f32.mrf.mxu0  ;;  %1115 = vmatmul.mubr.bf16.gmra.mxu1 %v569_v54 }
 0x10b   : > { %v563_v57 = vmax.f32 %v1089_v56, 0.0 }
 0x10c   : > { %v485_v58 = vpop.f32.mrf.mxu0 }
 0x10d   : > { %v561_v60 = vmax.f32 %v485_v58, 0.0  ;;  %v571_v63 = vpack.c.bf16 %v563_v57, %v562_v61 }
 0x10f   : > { %v570_v62 = vpack.c.bf16 %v561_v60, %v560_v59 }
 0x111   : > { %1118 = vmatprep.mubr.bf16.mxu1 %v570_v62 }
 0x112   : > { %1119 = vmatmul.mubr.bf16.gmra.mxu1 %v571_v63 }
 0x1ba   : > { %v1108_v0 = vpop.f32.mrf.mxu1 }
 0x1bc   : > { %v670_v1 = vpop.f32.mrf.mxu1 }
 0x1be   : > { %v1109_v2 = vpop.f32.mrf.mxu1 }
 0x1bf   : > { %v987_v3 = vpack.c.bf16 %v1109_v2, %v1108_v0 }
 0x1c0   : > { %v673_v4 = vpop.f32.mrf.mxu1 }
 0x1c1   : > { %1019 = vst [vmem:[%s226_s21 + $0x8] sm:$0xff] %v987_v3   ;;  %v982_v5 = vpack.c.bf16 %v673_v4, %v670_v1 }
 0x1c2   : > { %v1112_v6 = vpop.f32.mrf.mxu1 }
 0x1c3   : > { %983 = vst [vmem:[%s226_s21] sm:$0xff] %v982_v5  }
 0x1c4   : > { %v686_v7 = vpop.f32.mrf.mxu1 }
 0x1c6   : > { %v1113_v8 = vpop.f32.mrf.mxu1 }
 0x1c7   : > { %v997_v9 = vpack.c.bf16 %v1113_v8, %v1112_v6 }
 0x1c8   : > { %v689_v10 = vpop.f32.mrf.mxu1 }
 0x1c9   : > { %1021 = vst [vmem:[%s226_s21 + $0x18] sm:$0xff] %v997_v9   ;;  %v992_v11 = vpack.c.bf16 %v689_v10, %v686_v7 }
 0x1ca   : > { %v1116_v12 = vpop.f32.mrf.mxu1 }
 0x1cb   : > { %1020 = vst [vmem:[%s226_s21 + $0x10] sm:$0xff] %v992_v11  }
 0x1cc   : > { %v702_v13 = vpop.f32.mrf.mxu1 }
 0x1ce   : > { %v1117_v14 = vpop.f32.mrf.mxu1 }
 0x1cf   : > { %v1007_v15 = vpack.c.bf16 %v1117_v14, %v1116_v12 }
 0x1d0   : > { %v705_v16 = vpop.f32.mrf.mxu1 }
 0x1d1   : > { %1023 = vst [vmem:[%s226_s21 + $0x28] sm:$0xff] %v1007_v15   ;;  %v1002_v17 = vpack.c.bf16 %v705_v16, %v702_v13 }
 0x1d2   : > { %v1120_v18 = vpop.f32.mrf.mxu1 }
 0x1d3   : > { %1022 = vst [vmem:[%s226_s21 + $0x20] sm:$0xff] %v1002_v17  }
 0x1d4   : > { %v718_v19 = vpop.f32.mrf.mxu1 }
 0x1d6   : > { %v1121_v20 = vpop.f32.mrf.mxu1 }
 0x1d7   : > { %v1017_v21 = vpack.c.bf16 %v1121_v20, %v1120_v18 }
 0x1d8   : > { %v721_v22 = vpop.f32.mrf.mxu1 }
 0x1d9   : > { %1025 = vst [vmem:[%s226_s21 + $0x38] sm:$0xff] %v1017_v21   ;;  %v1012_v23 = vpack.c.bf16 %v721_v22, %v718_v19 }
 0x1db   : > { %1024 = vst [vmem:[%s226_s21 + $0x30] sm:$0xff] %v1012_v23  }
 0x1dc PF: > { %s13_s14 = sadd.s32 1, %s1192_s14   ;;  %s1305_s12 = smov %s1188_s13 }
 0x1dd   : > { %p10_p5 = scmp.ge.s32.totalorder %s13_s14, 4   ;;  %s1306_s13 = smov %s1308_s15 }
 0x1df   :  { %12 = sbr.rel (!%p10_p5) target bundleno = 2 (0x2), region = 71 }

</bundles_post_ra>
